<compile_context>
chip_gen: v7x
topology: tpu7x:2x2x1
jax: 0.10.0
libtpu: 0.0.40
codegen_flags: <defaults>
</compile_context>

<pallas_src>
import functools

import jax
import jax.numpy as jnp
from jax.experimental import pallas as pl
from jax.experimental.pallas import tpu as pltpu


def _round_up(x, m):
    return ((x + m - 1) // m) * m


def _pick_tile(total, max_tile, align):
    """Largest tile (multiple of `align`, <= max_tile) minimizing padding."""
    total_a = _round_up(max(total, align), align)
    best_t, best_pad = align, _round_up(total_a, align)
    t = align
    while t <= min(max_tile, total_a):
        padded = _round_up(total_a, t)
        if padded <= best_pad:          # ties -> prefer the larger tile
            best_t, best_pad = t, padded
        t += align
    return best_t, best_pad


def _ffn_kernel_fused(x_ref, w1_ref, b1_ref, w2_ref, b2_ref, o_ref):
    # Whole hidden dim fits in one panel: no accumulator needed.
    h = jnp.dot(x_ref[...], w1_ref[...], preferred_element_type=jnp.float32)
    h = jnp.maximum(h + b1_ref[...], 0.0)
    y = jnp.dot(h.astype(w2_ref.dtype), w2_ref[...],
                preferred_element_type=jnp.float32)
    o_ref[...] = jnp.maximum(y + b2_ref[...], 0.0).astype(o_ref.dtype)


def _ffn_kernel_split(x_ref, w1_ref, b1_ref, w2_ref, b2_ref, o_ref, acc_ref):
    # x_ref:  (TM, Dp)          row tile (compute dtype)
    # w1_ref: (Dp, TN)          panel k of W1 (compute dtype)
    # b1_ref: (1, TN)           panel k of b1 (f32)
    # w2_ref: (TN, Dp)          panel k of W2 (compute dtype)
    # b2_ref: (1, Dp)           b2 (f32)
    # o_ref:  (TM, Dp)          output tile
    # acc_ref:(TM, Dp) f32      VMEM accumulator, resident across the k axis
    k = pl.program_id(1)

    @pl.when(k == 0)
    def _():
        acc_ref[...] = jnp.zeros_like(acc_ref)

    # First matmul + bias + ReLU for this hidden panel (f32 accumulate on MXU).
    h = jnp.dot(x_ref[...], w1_ref[...], preferred_element_type=jnp.float32)
    h = jnp.maximum(h + b1_ref[...], 0.0)

    # Second matmul: this panel's contribution to the output rows.
    acc_ref[...] += jnp.dot(h.astype(w2_ref.dtype), w2_ref[...],
                            preferred_element_type=jnp.float32)

    @pl.when(k == pl.num_programs(1) - 1)
    def _():
        y = jnp.maximum(acc_ref[...] + b2_ref[...], 0.0)
        o_ref[...] = y.astype(o_ref.dtype)


@functools.partial(jax.jit, static_argnames=("tm", "tn", "compute_dtype"))
def feed_forward(x, w1, b1, w2, b2, *, tm=256, tn=512, compute_dtype=None):
    """x: (B, T, D). w1: (D, 4D), b1: (4D,), w2: (4D, D), b2: (D,).

    Returns relu(relu(x @ w1 + b1) @ w2 + b2), shape (B, T, D).
    compute_dtype: dtype fed to the MXU (e.g. jnp.bfloat16 on v6e/v7x);
    accumulation, biases and ReLU stay f32.
    """
    B, T, D = x.shape
    H = w1.shape[1]
    M = B * T
    out_dtype = x.dtype
    cdt = jnp.dtype(compute_dtype) if compute_dtype is not None else jnp.dtype(x.dtype)

    # ---- padding so every block is (8,128)-aligned and lane-dense ----------
    Dp = _round_up(max(D, 128), 128)
    tm_eff, Mp = _pick_tile(M, tm, 8)
    tn_eff, Hp = _pick_tile(H, tn, 128)

    x2 = jnp.pad(x.reshape(M, D), ((0, Mp - M), (0, Dp - D))).astype(cdt)
    w1p = jnp.pad(w1, ((0, Dp - D), (0, Hp - H))).astype(cdt)
    w2p = jnp.pad(w2, ((0, Hp - H), (0, Dp - D))).astype(cdt)
    b1p = jnp.pad(b1.astype(jnp.float32), (0, Hp - H)).reshape(1, Hp)
    b2p = jnp.pad(b2.astype(jnp.float32), (0, Dp - D)).reshape(1, Dp)

    n_row_tiles = Mp // tm_eff
    n_h_tiles = Hp // tn_eff

    itemsize = cdt.itemsize
    cost = pl.CostEstimate(
        flops=4 * Mp * Dp * Hp,                    # two matmuls, 2*M*D*H each
        transcendentals=0,
        bytes_accessed=(x2.size * itemsize
                        + w1p.size * itemsize
                        + w2p.size * itemsize
                        + b1p.size * 4 + b2p.size * 4
                        + Mp * Dp * jnp.dtype(out_dtype).itemsize),
    )

    if n_h_tiles == 1:
        # Fully fused single-panel path: no accumulator scratch traffic.
        out = pl.pallas_call(
            _ffn_kernel_fused,
            out_shape=jax.ShapeDtypeStruct((Mp, Dp), out_dtype),
            grid_spec=pltpu.PrefetchScalarGridSpec(
                num_scalar_prefetch=0,
                grid=(n_row_tiles,),
                in_specs=[
                    pl.BlockSpec((tm_eff, Dp), lambda i: (i, 0)),   # x rows
                    pl.BlockSpec((Dp, Hp), lambda i: (0, 0)),       # W1
                    pl.BlockSpec((1, Hp), lambda i: (0, 0)),        # b1
                    pl.BlockSpec((Hp, Dp), lambda i: (0, 0)),       # W2
                    pl.BlockSpec((1, Dp), lambda i: (0, 0)),        # b2
                ],
                out_specs=pl.BlockSpec((tm_eff, Dp), lambda i: (i, 0)),
            ),
            compiler_params=pltpu.CompilerParams(
                dimension_semantics=("parallel",)),
            cost_estimate=cost,
        )(x2, w1p, b1p, w2p, b2p)
    else:
        out = pl.pallas_call(
            _ffn_kernel_split,
            out_shape=jax.ShapeDtypeStruct((Mp, Dp), out_dtype),
            grid_spec=pltpu.PrefetchScalarGridSpec(
                num_scalar_prefetch=0,
                grid=(n_row_tiles, n_h_tiles),     # (rows: parallel, H: arbitrary)
                in_specs=[
                    pl.BlockSpec((tm_eff, Dp), lambda i, k: (i, 0)),   # x rows
                    pl.BlockSpec((Dp, tn_eff), lambda i, k: (0, k)),   # W1 panel
                    pl.BlockSpec((1, tn_eff), lambda i, k: (0, k)),    # b1 panel
                    pl.BlockSpec((tn_eff, Dp), lambda i, k: (k, 0)),   # W2 panel
                    pl.BlockSpec((1, Dp), lambda i, k: (0, 0)),        # b2
                ],
                out_specs=pl.BlockSpec((tm_eff, Dp), lambda i, k: (i, 0)),
                scratch_shapes=[pltpu.VMEM((tm_eff, Dp), jnp.float32)],
            ),
            compiler_params=pltpu.CompilerParams(
                dimension_semantics=("parallel", "arbitrary")),
            cost_estimate=cost,
        )(x2, w1p, b1p, w2p, b2p)

    return out[:M, :D].reshape(B, T, D)


def _init_params(key, num_embds):
    # Deterministic synthetic init (PyTorch-style uniform bounds), not a checkpoint.
    hidden = num_embds * 4
    k1, k2, k3, k4 = jax.random.split(key, 4)
    bound1 = 1.0 / (num_embds ** 0.5)
    bound2 = 1.0 / (hidden ** 0.5)
    # Stored as (in, out): y = x @ W + b  (equivalent to torch's x @ W.T, W (out,in))
    w1 = jax.random.uniform(k1, (num_embds, hidden), jnp.float32, -bound1, bound1)
    b1 = jax.random.uniform(k2, (hidden,), jnp.float32, -bound1, bound1)
    w2 = jax.random.uniform(k3, (hidden, num_embds), jnp.float32, -bound2, bound2)
    b2 = jax.random.uniform(k4, (num_embds,), jnp.float32, -bound2, bound2)
    return w1, b1, w2, b2


if __name__ == "__main__":
    key = jax.random.PRNGKey(0)
    B, T, D = 2, 8, 32          # num_embds = 32, hidden = 128
    kx, kp = jax.random.split(key)
    x = jax.random.normal(kx, (B, T, D), jnp.float32)
    w1, b1, w2, b2 = _init_params(kp, D)

    ref = jnp.maximum(jnp.maximum(x @ w1 + b1, 0.0) @ w2 + b2, 0.0)

    # f32 path (exact to reference), exercises the fused single-panel kernel.
    y = jax.block_until_ready(feed_forward(x, w1, b1, w2, b2))
    assert y.shape == (B, T, D)
    assert jnp.allclose(y, ref, atol=1e-5, rtol=1e-5)

    # bf16 MXU path (recommended on v6e/v7x): f32 accumulation, looser tolerance.
    y_bf16 = jax.block_until_ready(
        feed_forward(x, w1, b1, w2, b2, compute_dtype=jnp.bfloat16))
    assert jnp.allclose(y_bf16, ref, atol=5e-2, rtol=5e-2)

    # Force the hidden-split (accumulator) kernel path with a small tn.
    y_split = jax.block_until_ready(feed_forward(x, w1, b1, w2, b2, tn=128))
    assert jnp.allclose(y_split, ref, atol=1e-5, rtol=1e-5)

    print("KERNEL_OK")
</pallas_src>

<mosaic_0001>
module attributes {stable_mosaic.version = 11 : i64} {
  func.func @_ffn_kernel_fused(%arg0: i32, %arg1: memref<16x128xf32, #tpu.memory_space<vmem>>, %arg2: memref<128x128xf32, #tpu.memory_space<vmem>>, %arg3: memref<1x128xf32, #tpu.memory_space<vmem>>, %arg4: memref<128x128xf32, #tpu.memory_space<vmem>>, %arg5: memref<1x128xf32, #tpu.memory_space<vmem>>, %arg6: memref<16x128xf32, #tpu.memory_space<vmem>>) attributes {dimension_semantics = [#tpu.dimension_semantics<parallel>], iteration_bounds = array<i64: 1>, scalar_prefetch = 0 : i64, scratch_operands = 0 : i64, tpu.core_type = #tpu.core_type<tc>, window_params = [{transform_indices = @transform_0, window_bounds = array<i64: 16, 128>}, {pipeline_mode = #tpu.pipeline_mode<synchronous>, transform_indices = @transform_1, window_bounds = array<i64: 128, 128>}, {pipeline_mode = #tpu.pipeline_mode<synchronous>, transform_indices = @transform_2, window_bounds = array<i64: 1, 128>}, {pipeline_mode = #tpu.pipeline_mode<synchronous>, transform_indices = @transform_3, window_bounds = array<i64: 128, 128>}, {pipeline_mode = #tpu.pipeline_mode<synchronous>, transform_indices = @transform_4, window_bounds = array<i64: 1, 128>}, {transform_indices = @transform_5, window_bounds = array<i64: 16, 128>}]} {
    %c0 = arith.constant 0 : index
    %c0_0 = arith.constant 0 : index
    %0 = vector.load %arg1[%c0, %c0_0] : memref<16x128xf32, #tpu.memory_space<vmem>>, vector<16x128xf32>
    %c0_1 = arith.constant 0 : index
    %c0_2 = arith.constant 0 : index
    %1 = vector.load %arg2[%c0_1, %c0_2] : memref<128x128xf32, #tpu.memory_space<vmem>>, vector<128x128xf32>
    %cst = arith.constant dense<0.000000e+00> : vector<16x128xf32>
    %2 = tpu.matmul %0, %1, %cst {dimension_numbers = #tpu.dot_dimension_numbers<[1], [0], [0], [1], [0, 0, 1, 1], [], []>} : vector<16x128xf32>, vector<128x128xf32>, vector<16x128xf32> -> vector<16x128xf32>
    %c0_3 = arith.constant 0 : index
    %c0_4 = arith.constant 0 : index
    %3 = vector.load %arg3[%c0_3, %c0_4] : memref<1x128xf32, #tpu.memory_space<vmem>>, vector<1x128xf32>
    %4 = vector.broadcast %3 : vector<1x128xf32> to vector<16x128xf32>
    %5 = arith.addf %2, %4 : vector<16x128xf32>
    %cst_5 = arith.constant 0.000000e+00 : f32
    %6 = vector.broadcast %cst_5 : f32 to vector<16x128xf32>
    %7 = arith.maximumf %5, %6 : vector<16x128xf32>
    %c0_6 = arith.constant 0 : index
    %c0_7 = arith.constant 0 : index
    %8 = vector.load %arg4[%c0_6, %c0_7] : memref<128x128xf32, #tpu.memory_space<vmem>>, vector<128x128xf32>
    %cst_8 = arith.constant dense<0.000000e+00> : vector<16x128xf32>
    %9 = tpu.matmul %7, %8, %cst_8 {dimension_numbers = #tpu.dot_dimension_numbers<[1], [0], [0], [1], [0, 0, 1, 1], [], []>} : vector<16x128xf32>, vector<128x128xf32>, vector<16x128xf32> -> vector<16x128xf32>
    %c0_9 = arith.constant 0 : index
    %c0_10 = arith.constant 0 : index
    %10 = vector.load %arg5[%c0_9, %c0_10] : memref<1x128xf32, #tpu.memory_space<vmem>>, vector<1x128xf32>
    %11 = vector.broadcast %10 : vector<1x128xf32> to vector<16x128xf32>
    %12 = arith.addf %9, %11 : vector<16x128xf32>
    %cst_11 = arith.constant 0.000000e+00 : f32
    %13 = vector.broadcast %cst_11 : f32 to vector<16x128xf32>
    %14 = arith.maximumf %12, %13 : vector<16x128xf32>
    %c0_12 = arith.constant 0 : index
    %c0_13 = arith.constant 0 : index
    %15 = vector.load %arg6[%c0_12, %c0_13] : memref<16x128xf32, #tpu.memory_space<vmem>>, vector<16x128xf32>
    tpu.vector_store %arg6[%c0_12, %c0_13], %14 {strides = array<i32>} : memref<16x128xf32, #tpu.memory_space<vmem>>, vector<16x128xf32>,
    return
  }
  func.func @transform_0(%arg0: i32) -> (i32, i32) {
    %c0_i32 = arith.constant 0 : i32
    %c0_i32_0 = arith.constant 0 : i32
    return %arg0, %c0_i32 : i32, i32
  }
  func.func @transform_1(%arg0: i32) -> (i32, i32) {
    %c0_i32 = arith.constant 0 : i32
    %c0_i32_0 = arith.constant 0 : i32
    %c0_i32_1 = arith.constant 0 : i32
    return %c0_i32, %c0_i32_0 : i32, i32
  }
  func.func @transform_2(%arg0: i32) -> (i32, i32) {
    %c0_i32 = arith.constant 0 : i32
    %c0_i32_0 = arith.constant 0 : i32
    %c0_i32_1 = arith.constant 0 : i32
    return %c0_i32, %c0_i32_0 : i32, i32
  }
  func.func @transform_3(%arg0: i32) -> (i32, i32) {
    %c0_i32 = arith.constant 0 : i32
    %c0_i32_0 = arith.constant 0 : i32
    %c0_i32_1 = arith.constant 0 : i32
    return %c0_i32, %c0_i32_0 : i32, i32
  }
  func.func @transform_4(%arg0: i32) -> (i32, i32) {
    %c0_i32 = arith.constant 0 : i32
    %c0_i32_0 = arith.constant 0 : i32
    %c0_i32_1 = arith.constant 0 : i32
    return %c0_i32, %c0_i32_0 : i32, i32
  }
  func.func @transform_5(%arg0: i32) -> (i32, i32) {
    %c0_i32 = arith.constant 0 : i32
    %c0_i32_0 = arith.constant 0 : i32
    return %arg0, %c0_i32 : i32, i32
  }
}

</mosaic_0001>

<bundles_post_ra>
// kernel: feed_forward.1
= control target key start
LH: loop header
LB: loop body
LE: loop exit
PB: predicated region body
PF: predicated region fallthrough
CT: control target
= control target key end

     0   :  { %s544_s1 = inlined_call_operand.vmem [shape: f32[128,128], index: 1, kind: input, shape index: {}]   ;;  %s545_s0 = inlined_call_operand.vmem [shape: f32[16,128], index: 0, kind: input, shape index: {}]   ;;  %s546_s3 = inlined_call_operand.vmem [shape: f32[128,128], index: 3, kind: input, shape index: {}]   ;;  %s547_s2 = inlined_call_operand.vmem [shape: f32[1,128], index: 2, kind: input, shape index: {}]   ;;  %s548_s4 = inlined_call_operand.vmem [shape: f32[1,128], index: 4, kind: input, shape index: {}]   ;;  %s549_s5 = inlined_call_operand.vmem [shape: f32[16,128], index: 5, kind: output, shape index: {}]  }
   0x1   :  { %v22_v0 = vld [vmem:[%s544_s1] sm:$0xff]  ;;  %v23_v1 = vld [vmem:[%s544_s1 + $0x8] sm:$0xff]  ;;  %v24_v2 = vld [vmem:[%s544_s1 + $0x10] sm:$0xff] }
   0x2   :  { %v336_v3 = vpack.c.bf16 %v23_v1, %v22_v0  ;;  %v25_v4 = vld [vmem:[%s544_s1 + $0x18] sm:$0xff]  ;;  %v26_v6 = vld [vmem:[%s544_s1 + $0x20] sm:$0xff]  ;;  %v27_v7 = vld [vmem:[%s544_s1 + $0x28] sm:$0xff] }
   0x3   :  { %v340_v5 = vpack.c.bf16 %v25_v4, %v24_v2  ;;  %v344_v8 = vpack.c.bf16 %v27_v7, %v26_v6  ;;  %v28_v9 = vld [vmem:[%s544_s1 + $0x30] sm:$0xff]  ;;  %v29_v10 = vld [vmem:[%s544_s1 + $0x38] sm:$0xff]  ;;  %v20_v11 = vld [vmem:[%s545_s0] sm:$0xff] }
   0x4   :  { %337 = vmatprep.subr.bf16.mxu0 %v336_v3  ;;  %298 = vmatprep.mubr.f32.mxu0 %v20_v11  ;;  %v122_v12 = vld [vmem:[%s546_s3] sm:$0xff]  ;;  %v123_v13 = vld [vmem:[%s546_s3 + $0x8] sm:$0xff]  ;;  %v124_v14 = vld [vmem:[%s546_s3 + $0x10] sm:$0xff]  ;;  %v348_v20 = vpack.c.bf16 %v29_v10, %v28_v9 }
   0x5   :  { %339 = vmatpush3.bf16.msra.mxu0 %v336_v3  ;;  %v368_v15 = vpack.c.bf16 %v123_v13, %v122_v12  ;;  %v125_v16 = vld [vmem:[%s546_s3 + $0x18] sm:$0xff]  ;;  %v126_v18 = vld [vmem:[%s546_s3 + $0x20] sm:$0xff]  ;;  %v127_v19 = vld [vmem:[%s546_s3 + $0x28] sm:$0xff] }
   0x6   :  { %341 = vmatprep.subr.bf16.mxu0 %v340_v5  ;;  %v372_v17 = vpack.c.bf16 %v125_v16, %v124_v14  ;;  %v30_v21 = vld [vmem:[%s544_s1 + $0x40] sm:$0xff]  ;;  %v31_v22 = vld [vmem:[%s544_s1 + $0x48] sm:$0xff]  ;;  %v376_v23 = vpack.c.bf16 %v127_v19, %v126_v18  ;;  %v128_v24 = vld [vmem:[%s546_s3 + $0x30] sm:$0xff] }
   0x7   :  { %369 = vmatprep.subr.bf16.mxu1 %v368_v15  ;;  %v129_v25 = vld [vmem:[%s546_s3 + $0x38] sm:$0xff]  ;;  %v352_v26 = vpack.c.bf16 %v31_v22, %v30_v21  ;;  %v32_v27 = vld [vmem:[%s544_s1 + $0x50] sm:$0xff]  ;;  %v130_v30 = vld [vmem:[%s546_s3 + $0x40] sm:$0xff] }
   0x8   :  { %371 = vmatpush3.bf16.msra.mxu1 %v368_v15  ;;  %v33_v28 = vld [vmem:[%s544_s1 + $0x58] sm:$0xff]  ;;  %v380_v29 = vpack.c.bf16 %v129_v25, %v128_v24  ;;  %v131_v31 = vld [vmem:[%s546_s3 + $0x48] sm:$0xff]  ;;  %v34_v33 = vld [vmem:[%s544_s1 + $0x60] sm:$0xff] }
   0x9   :  { %343 = vmatpush3.bf16.msra.mxu0 %v340_v5  ;;  %373 = vmatprep.subr.bf16.mxu1 %v372_v17  ;;  %v356_v32 = vpack.c.bf16 %v33_v28, %v32_v27  ;;  %v35_v34 = vld [vmem:[%s544_s1 + $0x68] sm:$0xff]  ;;  %v384_v35 = vpack.c.bf16 %v131_v31, %v130_v30  ;;  %v132_v36 = vld [vmem:[%s546_s3 + $0x50] sm:$0xff]  ;;  %v133_v37 = vld [vmem:[%s546_s3 + $0x58] sm:$0xff] }
   0xa   :  { %345 = vmatprep.subr.bf16.mxu0 %v344_v8  ;;  %v360_v38 = vpack.c.bf16 %v35_v34, %v34_v33  ;;  %v36_v39 = vld [vmem:[%s544_s1 + $0x70] sm:$0xff]  ;;  %v37_v40 = vld [vmem:[%s544_s1 + $0x78] sm:$0xff]  ;;  %v388_v41 = vpack.c.bf16 %v133_v37, %v132_v36  ;;  %v134_v42 = vld [vmem:[%s546_s3 + $0x60] sm:$0xff] }
   0xb   :  { %v135_v43 = vld [vmem:[%s546_s3 + $0x68] sm:$0xff]  ;;  %v364_v44 = vpack.c.bf16 %v37_v40, %v36_v39  ;;  %v136_v47 = vld [vmem:[%s546_s3 + $0x70] sm:$0xff]  ;;  %v137_v48 = vld [vmem:[%s546_s3 + $0x78] sm:$0xff] }
   0xc   :  { %375 = vmatpush3.bf16.msra.mxu1 %v372_v17  ;;  %v392_v45 = vpack.c.bf16 %v135_v43, %v134_v42  ;;  %v21_v46 = vld [vmem:[%s545_s0 + $0x8] sm:$0xff]  ;;  %v396_v49 = vpack.c.bf16 %v137_v48, %v136_v47  ;;  %v228_v50 = vld [vmem:[%s547_s2] ss:$0 sm:$0xff] }
   0xd   :  { %347 = vmatpush3.bf16.msra.mxu0 %v344_v8  ;;  %377 = vmatprep.subr.bf16.mxu1 %v376_v23  ;;  %v229_v57 = vld [vmem:[%s548_s4] ss:$0 sm:$0xff] }
   0xe   :  { %349 = vmatprep.subr.bf16.mxu0 %v348_v20 }
  0x10   :  { %379 = vmatpush3.bf16.msra.mxu1 %v376_v23 }
  0x11   :  { %351 = vmatpush3.bf16.msra.mxu0 %v348_v20  ;;  %381 = vmatprep.subr.bf16.mxu1 %v380_v29 }
  0x12   :  { %353 = vmatprep.subr.bf16.mxu0 %v352_v26 }
  0x14   :  { %383 = vmatpush3.bf16.msra.mxu1 %v380_v29 }
  0x15   :  { %355 = vmatpush3.bf16.msra.mxu0 %v352_v26  ;;  %385 = vmatprep.subr.bf16.mxu1 %v384_v35 }
  0x16   :  { %357 = vmatprep.subr.bf16.mxu0 %v356_v32 }
  0x18   :  { %387 = vmatpush3.bf16.msra.mxu1 %v384_v35 }
  0x19   :  { %359 = vmatpush3.bf16.msra.mxu0 %v356_v32  ;;  %389 = vmatprep.subr.bf16.mxu1 %v388_v41 }
  0x1a   :  { %361 = vmatprep.subr.bf16.mxu0 %v360_v38 }
  0x1c   :  { %391 = vmatpush3.bf16.msra.mxu1 %v388_v41 }
  0x1d   :  { %363 = vmatpush3.bf16.msra.mxu0 %v360_v38  ;;  %393 = vmatprep.subr.bf16.mxu1 %v392_v45 }
  0x1e   :  { %365 = vmatprep.subr.bf16.mxu0 %v364_v44 }
  0x20   :  { %395 = vmatpush3.bf16.msra.mxu1 %v392_v45 }
  0x21   :  { %367 = vmatpush3.bf16.msra.mxu0 %v364_v44  ;;  %397 = vmatprep.subr.bf16.mxu1 %v396_v49 }
  0x24   :  { %299 = vmatmul.mubr.f32.vlgmr.msra.gmra.mrb[0].mxu0 %v21_v46  ;;  %399 = vmatpush3.bf16.msra.mxu1 %v396_v49 }
  0xf7   :  { %v300_v51 = vpop.f32.mrb[0].mxu0 }
  0xf8   :  { %v117_v52 = vadd.f32 %v300_v51, %v228_v50  ;;  %v111_v53 = vpop.f32.mrb[1].mxu0 }
  0xf9   :  { %v112_v54 = vadd.f32 %v228_v50, %v111_v53 }
  0xfa   :  { %v121_v56 = vmax.f32 %v117_v52, 0.0 }
  0xfb   :  { %v120_v55 = vmax.f32 %v112_v54, 0.0 }
  0xfd   :  { %333 = vmatprep.mubr.f32.mxu1 %v120_v55 }
  0xfe   :  { %334 = vmatmul.mubr.f32.vlgmr.msra.gmra.mrb[0].mxu1 %v121_v56 }
 0x1d1   :  { %v335_v58 = vpop.f32.mrb[0].mxu1 }
 0x1d2   :  { %v217_v59 = vadd.f32 %v335_v58, %v229_v57  ;;  %v211_v60 = vpop.f32.mrb[1].mxu1 }
 0x1d3   :  { %v212_v61 = vadd.f32 %v229_v57, %v211_v60 }
 0x1d4   :  { %v221_v62 = vmax.f32 %v217_v59, 0.0 }
 0x1d5   :  { %v220_v63 = vmax.f32 %v212_v61, 0.0 }
 0x1d6   :  { %223 = vst [vmem:[%s549_s5 + $0x8] sm:$0xff] %v221_v62 }
 0x1d7   :  { %222 = vst [vmem:[%s549_s5] sm:$0xff] %v220_v63 }

</bundles_post_ra>
